<compile_context>
chip_gen: v7x
topology: tpu7x:2x2x1
jax: 0.10.0
libtpu: 0.0.40
codegen_flags: <defaults>
</compile_context>

<pallas_src>
import functools

import jax
import jax.numpy as jnp
from jax import lax
from jax.experimental import pallas as pl
from jax.experimental.pallas import tpu as pltpu
import numpy as np

KSIZE = 7
PAD = 3
LANE_TILE = 1024        # inner lane tile for the reduction accumulators
HW_TILE_CAP = 4096      # max lanes per grid HW tile ("parallel" axis granularity)


def _vmem_capacity_bytes():
    """Physical VMEM per core (128 MiB v5e/v6e, 64 MiB v7x); conservative fallback."""
    try:
        info = pltpu.get_tpu_info()
        cap = getattr(info, "vmem_capacity_bytes", None)
        if cap:
            return int(cap)
    except Exception:
        pass
    return 64 * 1024 * 1024


def _pick_hw_tile(HW):
    """Grid tile along the lane (H*W) axis."""
    if HW % 128 != 0 or HW <= HW_TILE_CAP:
        return HW
    # Prefer the largest multiple of 128 dividing HW under the cap; a
    # non-divisor tile is also fine (padded tail lanes never feed valid output).
    for t in range(HW_TILE_CAP, 1023, -128):
        if HW % t == 0:
            return t
    return HW_TILE_CAP


def _pick_c_block(C, hw_tile, itemsize, budget):
    """Largest multiple-of-8 channel block within `budget` bytes (capped at C)."""
    if C <= 8:
        return C                      # full channel dim (legal: equals array dim)
    per_chan = max(1, hw_tile * itemsize)
    c_by_budget = max(8, (budget // per_chan) // 8 * 8)
    return int(min(c_by_budget, (C // 8) * 8, 1024))


# --------------------------------------------------------------------------
# Phase 1: lane-dense channel sum/max reduction.
# --------------------------------------------------------------------------
def _pool_kernel(x_ref, avg_ref, max_ref, *, c_total, needs_mask):
    # x_ref:   (1, c_blk, hw_tile)   one channel block of one image (lane-dense)
    # avg_ref: (1, 1, hw_tile) f32   running channel sum (mean after finalize)
    # max_ref: (1, 1, hw_tile) f32   running channel max
    # Both outputs are revisited across the C grid axis, so they stay resident
    # in VMEM and serve as the reduction accumulators.
    c_idx = pl.program_id(2)
    cb = x_ref.shape[1]
    hw_tile = x_ref.shape[2]

    @pl.when(c_idx == 0)
    def _init():
        avg_ref[...] = jnp.zeros(avg_ref.shape, jnp.float32)
        max_ref[...] = jnp.full(max_ref.shape, -jnp.inf, jnp.float32)

    step = 8 if cb % 8 == 0 else cb
    n_chunks = cb // step
    c_base = c_idx * cb                 # global channel offset of this block

    # Inner-tile the lane axis so psum/pmax stay at <= (8, 1024) f32 each.
    for hw0 in range(0, hw_tile, LANE_TILE):
        cur = min(LANE_TILE, hw_tile - hw0)

        def body(ic, carry, hw0=hw0, cur=cur):
            psum, pmax = carry
            start = ic * step
            if not isinstance(start, int):
                start = pl.multiple_of(start, step)
            chunk = x_ref[0, pl.ds(start, step), pl.ds(hw0, cur)].astype(jnp.float32)
            if needs_mask:
                ch = c_base + start + lax.broadcasted_iota(jnp.int32, (step, cur), 0)
                valid = ch < c_total
                psum = psum + jnp.where(valid, chunk, 0.0)
                pmax = jnp.maximum(pmax, jnp.where(valid, chunk, -jnp.inf))
            else:
                psum = psum + chunk
                pmax = jnp.maximum(pmax, chunk)
            return psum, pmax

        init = (jnp.zeros((step, cur), jnp.float32),
                jnp.full((step, cur), -jnp.inf, jnp.float32))
        if n_chunks <= 4:
            psum, pmax = init
            for ic in range(n_chunks):
                psum, pmax = body(ic, (psum, pmax))
        else:
            # fori_loop bounds live ranges (a long static unroll would spill).
            psum, pmax = lax.fori_loop(0, n_chunks, body, init, unroll=2)

        sl = pl.ds(hw0, cur)
        avg_ref[0, :, sl] = avg_ref[0, :, sl] + jnp.sum(psum, axis=0, keepdims=True)
        max_ref[0, :, sl] = jnp.maximum(max_ref[0, :, sl],
                                        jnp.max(pmax, axis=0, keepdims=True))

    @pl.when(c_idx == pl.num_programs(2) - 1)
    def _finalize():
        avg_ref[...] = avg_ref[...] * (1.0 / c_total)


# --------------------------------------------------------------------------
# Phase 2: 7x7 conv (2 -> 1 channels) + folded BN + sigmoid (per image).
# --------------------------------------------------------------------------
def _conv_bn_kernel(avg_ref, max_ref, w_ref, bn_ref, o_ref, pad_ref, *,
                    height, width):
    # avg_ref/max_ref: (1, 1, H, W) f32   pooled maps
    # w_ref:  (2*K*K,) SMEM               flattened conv weight (OIHW, O=1)
    # bn_ref: (2,)     SMEM               [bn_scale, bn_shift] (folded eval BN)
    # o_ref:  (1, 1, H, W)                attention map (module dtype)
    # pad_ref:(2, H+2P, W+2P) f32 VMEM    zero-padded pooled maps
    H, W = height, width

    # Zeroed every grid step: scratch is per-core and the grid may be
    # megacore-sharded, so a "zero once at program 0" gate would miss the
    # second core.  Cost is negligible next to the phase-1 HBM traffic.
    pad_ref[...] = jnp.zeros(pad_ref.shape, jnp.float32)
    # Single 2-D interior store per pooled map (no per-row scatter).
    pad_ref[0, pl.ds(PAD, H), pl.ds(PAD, W)] = avg_ref[0, 0, :, :]
    pad_ref[1, pl.ds(PAD, H), pl.ds(PAD, W)] = max_ref[0, 0, :, :]

    # Hoist all 98 scalar weight reads out of the tap loops.
    wts = [w_ref[i] for i in range(2 * KSIZE * KSIZE)]

    # 7x7 correlation, 2 in-channels -> 1 out-channel, no bias.  Four
    # independent accumulators break the 98-term serial FP chain.  Kept on
    # the VPU by design (MXU would run at <1% utilization here).
    n_acc = 4
    accs = [jnp.zeros((H, W), jnp.float32) for _ in range(n_acc)]
    use_vmem_taps = W >= 128   # lane-offset value slices would cross (8,128) tiles
    t = 0
    for ci in range(2):
        for kh in range(KSIZE):
            if use_vmem_taps:
                for kw in range(KSIZE):
                    tap = pad_ref[ci, pl.ds(kh, H), pl.ds(kw, W)]
                    wgt = wts[ci * KSIZE * KSIZE + kh * KSIZE + kw]
                    accs[t % n_acc] = accs[t % n_acc] + tap * wgt
                    t += 1
            else:
                row = pad_ref[ci, pl.ds(kh, H), :]          # (H, W + 2*PAD)
                for kw in range(KSIZE):
                    tap = row[:, kw:kw + W]                 # in-register slice
                    wgt = wts[ci * KSIZE * KSIZE + kh * KSIZE + kw]
                    accs[t % n_acc] = accs[t % n_acc] + tap * wgt
                    t += 1
    conv = (accs[0] + accs[1]) + (accs[2] + accs[3])

    # Folded eval-mode BatchNorm + sigmoid.
    y = conv * bn_ref[0] + bn_ref[1]
    o_ref[0, 0, :, :] = jax.nn.sigmoid(y).astype(o_ref.dtype)


# --------------------------------------------------------------------------
# Wrapper
# --------------------------------------------------------------------------
def spatial_attention(x, conv_w, bn_gamma, bn_beta, bn_mean, bn_var, eps=1e-3):
    """x: (N, C, H, W); conv_w: (1, 2, 7, 7); BN params: (1,) each (eval mode)."""
    N, C, H, W = x.shape
    HW = H * W

    # Per-generation budgets: block ~ VMEM/8 (>= 2 MiB), scoped limit ~ 3/4 VMEM
    # (keeps 2x double-buffered blocks + pooled outputs well inside v7x's 64 MiB
    # while not under-using v5e/v6e's 128 MiB).
    vmem_cap = _vmem_capacity_bytes()
    block_budget = max(2 * 1024 * 1024, vmem_cap // 8)
    vmem_limit = min((vmem_cap // 4) * 3, 112 * 1024 * 1024)

    hw_tile = _pick_hw_tile(HW)
    c_blk = _pick_c_block(C, hw_tile, x.dtype.itemsize, block_budget)
    n_hw = pl.cdiv(HW, hw_tile)
    n_cb = pl.cdiv(C, c_blk)
    needs_mask = (C % c_blk) != 0

    # Lane-dense view of x for the channel reduction (free contiguous reshape).
    x3 = x.reshape(N, C, HW)

    avg_flat, max_flat = pl.pallas_call(
        functools.partial(_pool_kernel, c_total=C, needs_mask=needs_mask),
        out_shape=(jax.ShapeDtypeStruct((N, 1, HW), jnp.float32),
                   jax.ShapeDtypeStruct((N, 1, HW), jnp.float32)),
        grid=(N, n_hw, n_cb),
        in_specs=[pl.BlockSpec((1, c_blk, hw_tile), lambda n, t, c: (n, c, t))],
        out_specs=(pl.BlockSpec((1, 1, hw_tile), lambda n, t, c: (n, 0, t)),
                   pl.BlockSpec((1, 1, hw_tile), lambda n, t, c: (n, 0, t))),
        compiler_params=pltpu.CompilerParams(
            dimension_semantics=("parallel", "parallel", "arbitrary"),
            vmem_limit_bytes=int(vmem_limit),
        ),
    )(x3)

    avg_maps = avg_flat.reshape(N, 1, H, W)   # free metadata reshape
    max_maps = max_flat.reshape(N, 1, H, W)

    scale = (bn_gamma / jnp.sqrt(bn_var + eps)).astype(jnp.float32)
    shift = (bn_beta - bn_mean * scale).astype(jnp.float32)
    bn_params = jnp.concatenate([scale, shift]).astype(jnp.float32)   # (2,)
    w_flat = conv_w.reshape(-1).astype(jnp.float32)                   # (2*7*7,)

    return pl.pallas_call(
        functools.partial(_conv_bn_kernel, height=H, width=W),
        out_shape=jax.ShapeDtypeStruct((N, 1, H, W), x.dtype),
        grid=(N,),
        in_specs=[
            pl.BlockSpec((1, 1, H, W), lambda n: (n, 0, 0, 0)),
            pl.BlockSpec((1, 1, H, W), lambda n: (n, 0, 0, 0)),
            pl.BlockSpec(memory_space=pltpu.MemorySpace.SMEM),
            pl.BlockSpec(memory_space=pltpu.MemorySpace.SMEM),
        ],
        out_specs=pl.BlockSpec((1, 1, H, W), lambda n: (n, 0, 0, 0)),
        scratch_shapes=[
            pltpu.VMEM((2, H + 2 * PAD, W + 2 * PAD), jnp.float32),
        ],
        compiler_params=pltpu.CompilerParams(
            dimension_semantics=("parallel",),
        ),
    )(avg_maps, max_maps, w_flat, bn_params)


def spatial_attention_ref(x, conv_w, bn_gamma, bn_beta, bn_mean, bn_var, eps=1e-3):
    """Pure-JAX reference (mirrors the PyTorch forward in eval mode)."""
    avg = jnp.mean(x, axis=1, keepdims=True)
    mx = jnp.max(x, axis=1, keepdims=True)
    xc = jnp.concatenate([avg, mx], axis=1).astype(jnp.float32)
    conv = lax.conv_general_dilated(
        xc, conv_w.astype(jnp.float32), window_strides=(1, 1),
        padding=[(PAD, PAD), (PAD, PAD)],
        dimension_numbers=("NCHW", "OIHW", "NCHW"))
    scale = bn_gamma / jnp.sqrt(bn_var + eps)
    shift = bn_beta - bn_mean * scale
    y = conv * scale.reshape(1, -1, 1, 1) + shift.reshape(1, -1, 1, 1)
    return jax.nn.sigmoid(y)


if __name__ == "__main__":
    key = jax.random.PRNGKey(0)
    k_x, k_w, k_g, k_b = jax.random.split(key, 4)

    N, C, H, W = 2, 4, 16, 16
    x = jax.random.normal(k_x, (N, C, H, W), dtype=jnp.float32)

    # Conv2d(2, 1, 7, bias=False) weight, deterministic init.
    fan_in = 2 * KSIZE * KSIZE
    conv_w = jax.random.normal(k_w, (1, 2, KSIZE, KSIZE), jnp.float32) / jnp.sqrt(fan_in)

    # BatchNorm2d(1) parameters (inference mode, slight perturbation so the
    # affine transform is non-trivial).
    bn_gamma = 1.0 + 0.1 * jax.random.normal(k_g, (1,), jnp.float32)
    bn_beta = 0.1 * jax.random.normal(k_b, (1,), jnp.float32)
    bn_mean = jnp.zeros((1,), jnp.float32)
    bn_var = jnp.ones((1,), jnp.float32)

    out = spatial_attention(x, conv_w, bn_gamma, bn_beta, bn_mean, bn_var)
    out = jax.block_until_ready(out)

    ref = spatial_attention_ref(x, conv_w, bn_gamma, bn_beta, bn_mean, bn_var)
    np.testing.assert_allclose(np.asarray(out), np.asarray(ref), rtol=1e-5, atol=1e-5)

    print("KERNEL_OK")
</pallas_src>

<mosaic_0001>
module attributes {stable_mosaic.version = 11 : i64} {
  func.func @_pool_kernel(%arg0: i32, %arg1: i32, %arg2: i32, %arg3: memref<1x4x256xf32, #tpu.memory_space<vmem>>, %arg4: memref<1x1x256xf32, #tpu.memory_space<vmem>>, %arg5: memref<1x1x256xf32, #tpu.memory_space<vmem>>) attributes {dimension_semantics = [#tpu.dimension_semantics<parallel>, #tpu.dimension_semantics<parallel>, #tpu.dimension_semantics<arbitrary>], iteration_bounds = array<i64: 2, 1, 1>, scalar_prefetch = 0 : i64, scratch_operands = 0 : i64, tpu.core_type = #tpu.core_type<tc>, window_params = [{transform_indices = @transform_0, window_bounds = array<i64: 1, 4, 256>}, {transform_indices = @transform_1, window_bounds = array<i64: 1, 1, 256>}, {transform_indices = @transform_2, window_bounds = array<i64: 1, 1, 256>}]} {
    %c0_i32 = arith.constant 0 : i32
    %0 = arith.cmpi eq, %arg2, %c0_i32 : i32
    %1 = arith.extui %0 : i1 to i32
    %c0_i32_0 = arith.constant 0 : i32
    %2 = arith.cmpi ne, %1, %c0_i32_0 : i32
    scf.if %2 {
      %cst_20 = arith.constant 0.000000e+00 : f32
      %28 = vector.broadcast %cst_20 : f32 to vector<1x1x256xf32>
      %c0_21 = arith.constant 0 : index
      %c0_22 = arith.constant 0 : index
      %c0_23 = arith.constant 0 : index
      %29 = vector.load %arg4[%c0_21, %c0_22, %c0_23] : memref<1x1x256xf32, #tpu.memory_space<vmem>>, vector<1x1x256xf32>
      tpu.vector_store %arg4[%c0_21, %c0_22, %c0_23], %28 {strides = array<i32>} : memref<1x1x256xf32, #tpu.memory_space<vmem>>, vector<1x1x256xf32>,
      %cst_24 = arith.constant 0xFF800000 : f32
      %30 = vector.broadcast %cst_24 : f32 to vector<1x1x256xf32>
      %c0_25 = arith.constant 0 : index
      %c0_26 = arith.constant 0 : index
      %c0_27 = arith.constant 0 : index
      %31 = vector.load %arg5[%c0_25, %c0_26, %c0_27] : memref<1x1x256xf32, #tpu.memory_space<vmem>>, vector<1x1x256xf32>
      tpu.vector_store %arg5[%c0_25, %c0_26, %c0_27], %30 {strides = array<i32>} : memref<1x1x256xf32, #tpu.memory_space<vmem>>, vector<1x1x256xf32>,
    } else {
    }
    %cst = arith.constant 0.000000e+00 : f32
    %3 = vector.broadcast %cst : f32 to vector<4x256xf32>
    %cst_1 = arith.constant 0xFF800000 : f32
    %4 = vector.broadcast %cst_1 : f32 to vector<4x256xf32>
    %c0 = arith.constant 0 : index
    %c0_2 = arith.constant 0 : index
    %c0_3 = arith.constant 0 : index
    %5 = vector.load %arg3[%c0, %c0_2, %c0_3] : memref<1x4x256xf32, #tpu.memory_space<vmem>>, vector<1x4x256xf32>
    %6 = vector.shape_cast %5 : vector<1x4x256xf32> to vector<4x256xf32>
    %7 = arith.addf %3, %6 : vector<4x256xf32>
    %8 = arith.maximumf %4, %6 : vector<4x256xf32>
    %c0_4 = arith.constant 0 : index
    %c0_5 = arith.constant 0 : index
    %c0_6 = arith.constant 0 : index
    %9 = vector.load %arg4[%c0_4, %c0_5, %c0_6] : memref<1x1x256xf32, #tpu.memory_space<vmem>>, vector<1x1x256xf32>
    %10 = vector.shape_cast %9 : vector<1x1x256xf32> to vector<1x256xf32>
    %cst_7 = arith.constant dense<0.000000e+00> : vector<256xf32>
    %11 = vector.multi_reduction <add>, %7, %cst_7 [0] : vector<4x256xf32> to vector<256xf32>
    %12 = vector.shape_cast %11 : vector<256xf32> to vector<1x256xf32>
    %13 = arith.addf %10, %12 : vector<1x256xf32>
    %c0_8 = arith.constant 0 : index
    %c0_9 = arith.constant 0 : index
    %c0_10 = arith.constant 0 : index
    %14 = vector.load %arg4[%c0_8, %c0_9, %c0_10] : memref<1x1x256xf32, #tpu.memory_space<vmem>>, vector<1x1x256xf32>
    %15 = vector.shape_cast %14 : vector<1x1x256xf32> to vector<1x256xf32>
    %16 = vector.shape_cast %13 : vector<1x256xf32> to vector<1x1x256xf32>
    tpu.vector_store %arg4[%c0_8, %c0_9, %c0_10], %16 {strides = array<i32>} : memref<1x1x256xf32, #tpu.memory_space<vmem>>, vector<1x1x256xf32>,
    %c0_11 = arith.constant 0 : index
    %c0_12 = arith.constant 0 : index
    %c0_13 = arith.constant 0 : index
    %17 = vector.load %arg5[%c0_11, %c0_12, %c0_13] : memref<1x1x256xf32, #tpu.memory_space<vmem>>, vector<1x1x256xf32>
    %18 = vector.shape_cast %17 : vector<1x1x256xf32> to vector<1x256xf32>
    %cst_14 = arith.constant dense<0xFF800000> : vector<256xf32>
    %19 = vector.multi_reduction <maximumf>, %8, %cst_14 [0] : vector<4x256xf32> to vector<256xf32>
    %20 = vector.shape_cast %19 : vector<256xf32> to vector<1x256xf32>
    %21 = arith.maximumf %18, %20 : vector<1x256xf32>
    %c0_15 = arith.constant 0 : index
    %c0_16 = arith.constant 0 : index
    %c0_17 = arith.constant 0 : index
    %22 = vector.load %arg5[%c0_15, %c0_16, %c0_17] : memref<1x1x256xf32, #tpu.memory_space<vmem>>, vector<1x1x256xf32>
    %23 = vector.shape_cast %22 : vector<1x1x256xf32> to vector<1x256xf32>
    %24 = vector.shape_cast %21 : vector<1x256xf32> to vector<1x1x256xf32>
    tpu.vector_store %arg5[%c0_15, %c0_16, %c0_17], %24 {strides = array<i32>} : memref<1x1x256xf32, #tpu.memory_space<vmem>>, vector<1x1x256xf32>,
    %c0_i32_18 = arith.constant 0 : i32
    %25 = arith.cmpi eq, %arg2, %c0_i32_18 : i32
    %26 = arith.extui %25 : i1 to i32
    %c0_i32_19 = arith.constant 0 : i32
    %27 = arith.cmpi ne, %26, %c0_i32_19 : i32
    scf.if %27 {
      %c0_20 = arith.constant 0 : index
      %c0_21 = arith.constant 0 : index
      %c0_22 = arith.constant 0 : index
      %28 = vector.load %arg4[%c0_20, %c0_21, %c0_22] : memref<1x1x256xf32, #tpu.memory_space<vmem>>, vector<1x1x256xf32>
      %cst_23 = arith.constant 2.500000e-01 : f32
      %29 = vector.broadcast %cst_23 : f32 to vector<1x1x256xf32>
      %30 = arith.mulf %28, %29 : vector<1x1x256xf32>
      %c0_24 = arith.constant 0 : index
      %c0_25 = arith.constant 0 : index
      %c0_26 = arith.constant 0 : index
      %31 = vector.load %arg4[%c0_24, %c0_25, %c0_26] : memref<1x1x256xf32, #tpu.memory_space<vmem>>, vector<1x1x256xf32>
      tpu.vector_store %arg4[%c0_24, %c0_25, %c0_26], %30 {strides = array<i32>} : memref<1x1x256xf32, #tpu.memory_space<vmem>>, vector<1x1x256xf32>,
    } else {
    }
    return
  }
  func.func @transform_0(%arg0: i32, %arg1: i32, %arg2: i32) -> (i32, i32, i32) {
    %c0_i32 = arith.constant 0 : i32
    return %arg0, %arg2, %arg1 : i32, i32, i32
  }
  func.func @transform_1(%arg0: i32, %arg1: i32, %arg2: i32) -> (i32, i32, i32) {
    %c0_i32 = arith.constant 0 : i32
    %c0_i32_0 = arith.constant 0 : i32
    return %arg0, %c0_i32, %arg1 : i32, i32, i32
  }
  func.func @transform_2(%arg0: i32, %arg1: i32, %arg2: i32) -> (i32, i32, i32) {
    %c0_i32 = arith.constant 0 : i32
    %c0_i32_0 = arith.constant 0 : i32
    return %arg0, %c0_i32, %arg1 : i32, i32, i32
  }
}

</mosaic_0001>

<bundles_post_ra>
// kernel: tpu_custom_call.1
= control target key start
LH: loop header
LB: loop body
LE: loop exit
PB: predicated region body
PF: predicated region fallthrough
CT: control target
= control target key end

     0   :  { %8 = vsyncpa [#allocation3], 0  ;;  %s960_s0 = inlined_call_operand.hbm [shape: f32[2,4,256], index: 0, kind: input, shape index: {}]   ;;  %s961_s1 = inlined_call_operand.hbm [shape: f32[2,1,256], index: 1, kind: output, shape index: {0}]   ;;  %s962_s2 = inlined_call_operand.hbm [shape: f32[2,1,256], index: 2, kind: output, shape index: {1}]  }
   0x1   :  { %10 = vsyncpa [#allocation3 + $0x1], 0 }
   0x2   :  { %11 = vsyncpa [#allocation4], 0 }
   0x3   :  { %13 = vsyncpa [#allocation4 + $0x1], 0 }
   0x4   :  { %14 = vsyncpa [#allocation7], 0 }
   0x5   :  { %16 = vsyncpa [#allocation7 + $0x1], 0  ;;  %s726_s9 = smov 0   ;;  %s728_s10 = smov 0  }
   0x6   :  { %s730_s11 = smov 0   ;;  %s732_s12 = smov 0  }
   0x7   :  { %s734_s13 = smov 0   ;;  %s736_s14 = smov 0  }
   0x8 LB: > { %s466_s15 = sadd.s32 4294967295, %s703_s14   ;;  %s467_s16 = sadd.s32 4294967294, %s703_s14   ;;  %s703_s14 = sphi %s736_s14, %s22_s14   ;;  %s699_s13 = sphi %s734_s13, %s980_s13   ;;  %s695_s12 = sphi %s732_s12, %s979_s12   ;;  %s691_s11 = sphi %s730_s11, %s978_s11   ;;  %s687_s10 = sphi %s728_s10, %s977_s10   ;;  %s683_s9 = sphi %s726_s9, %s976_s9  }
   0x9   : > { %s41_s17 = sadd.s32 1, %s699_s13  ;;  %s52_s18 = sadd.s32 1, %s691_s11 }
   0xa   : > { %p43_p0 = scmp.ge.s32.totalorder %s41_s17, 2  ;;  %p59_p1 = scmp.ne.s32.totalorder %s691_s11, %s687_s10 }
   0xb   : > { %p60_p2 = scmp.eq.s32.totalorder %s703_s14, 0  ;;  %p65_p3 = scmp.ne.s32.totalorder %s687_s10, %s683_s9 }
   0xc   : > { %s982_s17 = smov (%p43_p0, %s41_s17), 0  ;;  %p66_p5 = scmp.eq.s32.totalorder %s466_s15, 0 }
   0xd   : > { %p767_p4 = por %p60_p2, %p59_p1  ;;  %s45_s20 = ssub.s32 %s699_s13, %s982_s17 }
   0xe   : > { %p91_p6 = scmp.eq.s32.totalorder %s466_s15, 1  ;;  %p50_p7 = scmp.eq.s32.totalorder %s45_s20, 0 }
   0xf   : > { %p773_p8 = por %p66_p5, %p65_p3  ;;  %p97_p10 = scmp.eq.s32.totalorder %s467_s16, 1 }
  0x10   : > { %p777_p9 = por %p91_p6, %p59_p1  ;;  %p505_p13 = scmp.lt.s32.totalorder %s703_s14, 2 }
  0x11   : > { %s782_s23 = scalar_select %p50_p7, %s691_s11, %s52_s18  }
  0x12   : > { %s966_s22 = scalar_select %p777_p9, 1, 0 }
  0x13   : > { %p784_p11 = por %p97_p10, %p65_p3  ;;  %s145_s25 = sand.u32 1, %s691_s11  }
  0x14   : > { %s470_s26 = sshll.u32 %s145_s25, 3  ;;  %s485_s27 = sshll.u32 %s699_s13, 7 }
  0x15   : > { %s967_s24 = scalar_select %p784_p11, 1, 0 }
  0x16   : > { %s795_s30 = scalar_lea.hbm %s960_s0, %s485_s27  ;;  %s149_s3 = scalar_lea.vmem [#allocation2], %s470_s26 }
  0x17   : > { %s161_s4 = sshll.u32 %s149_s3, 4  ;;  %p801_p0 = pnand %p505_p13, %p767_p4  ;;  %s797_s4 = int_to_ptr.vmem [resolvable:$true] %s161_s4 }
  0x18   : > { %s146_s6 = scalar_lea.sflag [#allocation3], %s145_s25  ;;  %s559_s7 = scalar_lea.hbm %s795_s30, 128 }
  0x19   : > { %p560_p3 = scmp.ne.s32.totalorder %s795_s30, %s559_s7  ;;  %p561_p5 = pneg %p801_p0 }
  0x1a   : > { %s564_s16 = scalar_lea.hbm %s960_s0, 256  ;;  %p565_p4 = scmp.lt.u32.totalorder %s795_s30, %s960_s0 }
  0x1b   : > { %p562_p6 = pnand %p561_p5, %p560_p3  ;;  %p566_p10 = scmp.lt.u32.totalorder %s564_s16, %s559_s7 }
  0x1c   : > { %p568_p12 = scmp.lt.u32.totalorder %s559_s7, %s795_s30 }
  0x1d   : > { %p563_p7 = pneg %p562_p6  ;;  %p567_p13 = por %p566_p10, %p565_p4 }
  0x1f   : > { %p569_p1 = por %p568_p12, %p567_p13 }
  0x21   : > { %p570_p2 = pnand %p569_p1, %p563_p7 }
  0x23   : > { %573 = shalt.err (!%p570_p2)
}
  0x24   : > { %s574_s20 = scalar_lea.vmem %s797_s4, 128  ;;  %s705_s25 = smov [#allocation2]  }
  0x25   : > { %p575_p3 = scmp.ne.s32.totalorder %s797_s4, %s574_s20  ;;  %s579_s26 = sshll.u32 %s705_s25, 4  ;;  %s580_s26 = int_to_ptr.vmem [resolvable:$false] %s579_s26 }
  0x26   : > { %s581_s27 = scalar_lea.vmem %s580_s26, 256  ;;  %p582_p9 = scmp.lt.s32.totalorder %s797_s4, %s580_s26 }
  0x27   : > { %p577_p6 = pnand %p575_p3, %p561_p5  ;;  %p583_p4 = scmp.lt.s32.totalorder %s581_s27, %s574_s20 }
  0x29   : > { %p578_p11 = pneg %p577_p6  ;;  %p584_p10 = por %p583_p4, %p582_p9 }
  0x2b   : > { %p585_p12 = pnand %p584_p10, %p578_p11 }
  0x2d   : > { %588 = shalt.err (!%p585_p12)
}
  0x2e   : > { %497 = dma.hbm_to_vmem [thread:$0]  (!%p801_p0), %s795_s30, 128, %s797_s4, %s146_s6  }
  0x2f   : > { %p969_p1 = scmp.lt.s32.totalorder %s703_s14, 3  ;;  %p970_p2 = scmp.ge.s32.totalorder %s703_s14, 1 }
  0x31   : > { %p167_p5 = pnand %p970_p2, %p969_p1 }
  0x32   : > { %s837_s28 = sand.u32 (!%p167_p5), 1, %s687_s10  }
  0x33   : > { %170 = sbr.rel (%p167_p5) target bundleno = 121 (0x79), region = 24  ;;  %s474_s29 = sshll.u32 (!%p167_p5), %s837_s28, 3 }
  0x34   : > { %s173_s3 = scalar_lea.sflag (!%p167_p5), [#allocation3], %s837_s28  ;;  %s176_s7 = scalar_lea.vmem (!%p167_p5), [#allocation2], %s474_s29 }
  0x3a   : > { %670 = dma.done.wait (%p773_p8), %s173_s3, 128  }
  0x3b   : > { %672 = vsyncadd (%p773_p8), %s173_s3, 4294967168  ;;  %s475_s30 = sshll.u32 %s837_s28, 1  ;;  %v209_v0 = vlaneseq  ;;  %v706_v2 = vmov 0.0   ;;  %v707_v3 = vmov -inf   ;;  %vm221_vm1 = vcmask 1043456   ;;  %v215_v4 = vld [vmem:[%s176_s7] sm:$0xff] }
  0x3c   : > { %s850_s4 = scalar_lea.vmem [#allocation5], %s475_s30  ;;  %s855_s5 = scalar_lea.vmem [#allocation6], %s475_s30  ;;  %v219_v5 = vcombine.high %v215_v4, %v215_v4  ;;  %v264_v6 = vsel %vm221_vm1, %v215_v4, -inf  ;;  %v222_v7 = vsel %vm221_vm1, %v215_v4, 0.0  ;;  %v708_v16 = vmov 1966171168  }
  0x3d   : > { %vm846_vm0 = vcmp.lt.s32.totalorder %v209_v0, 256  ;;  %v265_v8 = vrot.slane %v264_v6, 4  ;;  %v223_v9 = vrot.slane %v222_v7, 4  ;;  %v240_v17 = vunpack.c.l.s4 %v708_v16  ;;  %s486_s21 = sshll.u32 %s695_s12, 5  ;;  %s342_s6 = sshll.u32 %s855_s5, 4  ;;  %s871_s6 = int_to_ptr.vmem [resolvable:$true] %s342_s6 }
  0x3e   : > { %213 = vst.msk [vmem:[%s850_s4] sm:$0x3] %vm846_vm0, %v706_v2  ;;  %214 = vst.msk [vmem:[%s855_s5] sm:$0x3] %vm846_vm0, %v707_v3  ;;  %v271_v10 = vsel %vm221_vm1, %v219_v5, -inf  ;;  %v229_v11 = vsel %vm221_vm1, %v219_v5, 0.0  ;;  %s869_s16 = scalar_lea.hbm %s962_s2, %s486_s21 }
  0x3f   : > { %v266_v12 = vmax.f32 %v264_v6, %v265_v8  ;;  %v272_v13 = vrot.slane %v271_v10, 4  ;;  %v224_v14 = vadd.f32 %v223_v9, %v222_v7  ;;  %v230_v15 = vrot.slane %v229_v11, 4  ;;  %s310_s18 = scalar_lea.sflag [#allocation7], %s837_s28  ;;  %s589_s19 = scalar_lea.vmem %s871_s6, 32 }
  0x40   : > { %v241_v26 = vunpack.c.0.s8 %v240_v17  ;;  %v243_v27 = vshrl.u32 %v209_v0, 7  ;;  %p590_p8 = scmp.ne.s32.totalorder %s871_s6, %s589_s19  ;;  %p973_p9 = scmp.ne.s32.totalorder %s966_s22, 0 }
  0x41   : > { %v267_v18 = vrot.slane %v266_v12, 2  ;;  %v273_v19 = vmax.f32 %v271_v10, %v272_v13  ;;  %v225_v20 = vrot.slane %v224_v14, 2  ;;  %v231_v21 = vadd.f32 %v230_v15, %v229_v11  ;;  %s709_s20 = smov [#allocation6]  }
  0x42   : > { %v244_v36 = vsub.s32 %v241_v26, %v243_v27  ;;  %p591_p11 = pnand %p590_p8, %p973_p9  ;;  %s593_s25 = sshll.u32 %s709_s20, 4  ;;  %s594_s25 = int_to_ptr.vmem [resolvable:$false] %s593_s25 }
  0x43   : > { %v268_v22 = vmax.f32 %v266_v12, %v267_v18  ;;  %v274_v23 = vrot.slane %v273_v19, 2  ;;  %v226_v24 = vadd.f32 %v225_v20, %v224_v14  ;;  %v232_v25 = vrot.slane %v231_v21, 2  ;;  %s595_s26 = scalar_lea.vmem %s594_s25, 64  ;;  %p596_p7 = scmp.lt.s32.totalorder %s871_s6, %s594_s25 }
  0x44   : > { %p592_p0 = pneg %p591_p11  ;;  %p597_p13 = scmp.lt.s32.totalorder %s595_s26, %s589_s19 }
  0x45   : > { %v269_v28 = vrot.slane %v268_v22, 1  ;;  %v275_v29 = vmax.f32 %v273_v19, %v274_v23  ;;  %v227_v30 = vrot.slane %v226_v24, 1  ;;  %v233_v31 = vadd.f32 %v232_v25, %v231_v21  ;;  %v260_v43 = vld [vmem:[%s855_s5] sm:$0x3]  ;;  %v217_v44 = vld [vmem:[%s850_s4] sm:$0x3] }
  0x46   : > { %p598_p3 = por %p597_p13, %p596_p7 }
  0x47   : > { %v270_v32 = vmax.f32 %v268_v22, %v269_v28  ;;  %v276_v33 = vrot.slane %v275_v29, 1  ;;  %v228_v34 = vadd.f32 %v227_v30, %v226_v24  ;;  %v234_v35 = vrot.slane %v233_v31, 1 }
  0x48   : > { %p599_p6 = pnand %p598_p3, %p592_p0 }
  0x49   : > { %v277_v37 = vmax.f32 %v275_v29, %v276_v33  ;;  %v235_v38 = vadd.f32 %v234_v35, %v233_v31 }
  0x4b   : > { %v280_v39 = vcombine.low %v270_v32, %v277_v37  ;;  %v238_v40 = vcombine.low %v228_v34, %v235_v38 }
  0x4d   : > { %v287_v41 = vrot.slane %v280_v39, %v244_v36  ;;  %v245_v42 = vrot.slane %v238_v40, %v244_v36 }
  0x4f   : > { %v294_v45 = vrot.slane %v287_v41, %v244_v36  ;;  %v252_v46 = vrot.slane %v245_v42, %v244_v36 }
  0x51   : > { %v296_v47 = vmax.f32 %v260_v43, %v294_v45  ;;  %v254_v48 = vadd.f32 %v252_v46, %v217_v44 }
  0x53   : > { %297 = vst.msk [vmem:[%s855_s5] sm:$0x3] %vm846_vm0, %v296_v47  ;;  %259 = vst.msk [vmem:[%s850_s4] sm:$0x3] %vm846_vm0, %v254_v48 }
  0x54   : > { %602 = shalt.err (!%p599_p6)
}
  0x55   : > { %s603_s27 = scalar_lea.hbm %s869_s16, 32  ;;  %s607_s7 = scalar_lea.hbm %s962_s2, 64 }
  0x56   : > { %p604_p4 = scmp.ne.s32.totalorder %s869_s16, %s603_s27  ;;  %p608_p1 = scmp.lt.u32.totalorder %s869_s16, %s962_s2 }
  0x57   : > { %p609_p2 = scmp.lt.u32.totalorder %s607_s7, %s603_s27  ;;  %p611_p8 = scmp.lt.u32.totalorder %s603_s27, %s869_s16 }
  0x58   : > { %p605_p10 = pnand %p604_p4, %p973_p9 }
  0x59   : > { %p610_p5 = por %p609_p2, %p608_p1 }
  0x5a   : > { %p606_p12 = pneg %p605_p10 }
  0x5b   : > { %p612_p11 = por %p611_p8, %p610_p5 }
  0x5d   : > { %p613_p0 = pnand %p612_p11, %p606_p12 }
  0x5f   : > { %616 = shalt.err (!%p613_p0)
}
  0x60   : > { %491 = dma.vmem_to_hbm [thread:$0]  (%p973_p9), %s871_s6, 32, %s869_s16, %s310_s18   ;;  %v301_v49 = vld [vmem:[%s850_s4] sm:$0x3] }
  0x61   : > { %s326_s8 = sshll.u32 %s850_s4, 4  ;;  %v302_v50 = vmul.f32 0.25, %v301_v49  ;;  %s908_s20 = scalar_lea.hbm %s961_s1, %s486_s21  ;;  %s910_s8 = int_to_ptr.vmem [resolvable:$true] %s326_s8 }
  0x62   : > { %s305_s25 = scalar_lea.sflag [#allocation4], %s837_s28  ;;  %s617_s26 = scalar_lea.vmem %s910_s8, 32 }
  0x63   : > { %303 = vst.msk [vmem:[%s850_s4] sm:$0x3] %vm846_vm0, %v302_v50  ;;  %p618_p7 = scmp.ne.s32.totalorder %s910_s8, %s617_s26  ;;  %s710_s12 = smov [#allocation5]  }
  0x64   : > { %s621_s6 = sshll.u32 %s710_s12, 4  ;;  %s622_s6 = int_to_ptr.vmem [resolvable:$false] %s621_s6 }
  0x65   : > { %p619_p13 = pnand %p618_p7, %p973_p9  ;;  %s623_s16 = scalar_lea.vmem %s622_s6, 64 }
  0x66   : > { %p624_p6 = scmp.lt.s32.totalorder %s910_s8, %s622_s6  ;;  %p625_p4 = scmp.lt.s32.totalorder %s623_s16, %s617_s26 }
  0x67   : > { %p620_p3 = pneg %p619_p13 }
  0x68   : > { %p626_p10 = por %p625_p4, %p624_p6 }
  0x6a   : > { %p627_p12 = pnand %p626_p10, %p620_p3 }
  0x6c   : > { %630 = shalt.err (!%p627_p12)
}
  0x6d   : > { %s631_s28 = scalar_lea.hbm %s908_s20, 32  ;;  %s635_s18 = scalar_lea.hbm %s961_s1, 64 }
  0x6e   : > { %p632_p1 = scmp.ne.s32.totalorder %s908_s20, %s631_s28  ;;  %p636_p8 = scmp.lt.u32.totalorder %s908_s20, %s961_s1 }
  0x6f   : > { %p637_p11 = scmp.lt.u32.totalorder %s635_s18, %s631_s28  ;;  %p639_p7 = scmp.lt.u32.totalorder %s631_s28, %s908_s20 }
  0x70   : > { %p633_p2 = pnand %p632_p1, %p973_p9 }
  0x71   : > { %p638_p0 = por %p637_p11, %p636_p8 }
  0x72   : > { %p634_p5 = pneg %p633_p2 }
  0x73   : > { %p640_p13 = por %p639_p7, %p638_p0 }
  0x75   : > { %p641_p3 = pnand %p640_p13, %p634_p5 }
  0x77   : > { %644 = shalt.err (!%p641_p3)
}
  0x78   : > { %490 = dma.vmem_to_hbm [thread:$0]  (%p973_p9), %s910_s8, 32, %s908_s20, %s305_s25  }
  0x79 PF: > { %s354_s3 = sand.u32 1, %s683_s9   ;;  %p974_p6 = scmp.ne.s32.totalorder %s967_s24, 0 }
  0x7a   : > { %p975_p4 = scmp.ge.s32.totalorder %s703_s14, 2  ;;  %s355_s7 = scalar_lea.sflag [#allocation4], %s354_s3 }
  0x7c   : > { %p499_p10 = pnand %p975_p4, %p974_p6 }
  0x7e   : > { %674 = dma.done.wait (!%p499_p10), %s355_s7, 32  }
  0x7f   : > { %676 = vsyncadd (!%p499_p10), %s355_s7, 4294967264  ;;  %s364_s30 = scalar_lea.sflag [#allocation7], %s354_s3 }
  0x80   : > { %678 = dma.done.wait (!%p499_p10), %s364_s30, 32  }
  0x81   : > { %680 = vsyncadd (!%p499_p10), %s364_s30, 4294967264  ;;  %s22_s14 = sadd.s32 1, %s703_s14   ;;  %s976_s9 = smov %s687_s10 }
  0x82   : > { %p19_p12 = scmp.ge.s32.totalorder %s22_s14, 4   ;;  %s977_s10 = smov %s691_s11 }
  0x83   : > { %s978_s11 = smov %s782_s23  ;;  %s979_s12 = smov %s699_s13 }
  0x84   : > { %s980_s13 = smov %s982_s17  ;;  %21 = sbr.rel (!%p19_p12) target bundleno = 8 (0x8), region = 94 }
  0x8b   :  { %369 = vsyncpa [#allocation3], 1 }
  0x8c   :  { %371 = vsyncpa [#allocation3 + $0x1], 1 }
  0x8d   :  { %372 = vsyncpa [#allocation4], 1 }
  0x8e   :  { %374 = vsyncpa [#allocation4 + $0x1], 1 }
  0x8f   :  { %375 = vsyncpa [#allocation7], 1 }
  0x90   :  { %377 = vsyncpa [#allocation7 + $0x1], 1 }

</bundles_post_ra>
